<compile_context>
chip_gen: v5e
topology: v5e:2x2
jax: 0.10.0
libtpu: 0.0.40
codegen_flags: <defaults>
</compile_context>

<pallas_src>
import jax
import jax.numpy as jnp
from jax.experimental import pallas as pl
from jax.experimental.pallas import tpu as pltpu

_IN = 28 * 28      # 784
_H = 32            # hidden width
_OUT = 10          # real classes
_OUT_PAD = 128     # lane-dense padded width for the last MXU matmul (compute only)


def _mlp_kernel(x_ref, w1_ref, b1_ref, w2_ref, b2_ref, w3_ref, b3_ref, o_ref):
    # x_ref: (TB, 784) f32 batch tile; weights/biases are batch-invariant and
    # stay resident in VMEM across all grid iterations.
    # Cast to bf16 here (in-register) instead of materializing a bf16 copy in HBM.
    x = x_ref[...].astype(jnp.bfloat16)

    # Layer 1: Linear(784 -> 32) + Sigmoid   (bf16 in, f32 accumulate)
    h1 = jnp.dot(x, w1_ref[...], preferred_element_type=jnp.float32) + b1_ref[...]
    h1 = jax.nn.sigmoid(h1)

    # Layer 2: Linear(32 -> 32) + Sigmoid    (f32; tiny)
    h2 = jnp.dot(h1, w2_ref[...], preferred_element_type=jnp.float32) + b2_ref[...]
    h2 = jax.nn.sigmoid(h2)

    # Layer 3: Linear(32 -> 128 padded) + Softmax over the last dim.
    # Padded lanes carry zero weights and a -1e30 bias, so exp underflows to
    # exactly 0 there and the 128-lane softmax equals the 10-class softmax.
    logits = jnp.dot(h2, w3_ref[...], preferred_element_type=jnp.float32) + b3_ref[...]
    m = jnp.max(logits, axis=-1, keepdims=True)
    e = jnp.exp(logits - m)
    denom = jnp.sum(e, axis=-1, keepdims=True)
    inv = pl.reciprocal(denom, approx=False)          # exact: rows sum to 1
    o_ref[...] = (e * inv)[:, :_OUT]                  # store only the 10 real classes


def prepare_params(params):
    """One-time (param-load-time) conversion to kernel layout."""
    w1, b1, w2, b2, w3, b3 = params
    w1_bf = w1.astype(jnp.bfloat16)                                   # halves the w1 stream
    w3_pad = jnp.zeros((_H, _OUT_PAD), jnp.float32).at[:, :_OUT].set(w3)
    b3_pad = jnp.full((1, _OUT_PAD), -1e30, jnp.float32).at[:, :_OUT].set(b3)
    return (w1_bf, b1, w2, b2, w3_pad, b3_pad)


def _round_up(x, m):
    return (x + m - 1) // m * m


def neural_network_forward(x_nchw, kparams, *, batch_tile=1024):
    """x_nchw: (B, 1, 28, 28) float32 -> (B, 10) float32 probabilities.

    kparams must come from prepare_params()."""
    w1_bf, b1, w2, b2, w3_pad, b3_pad = kparams
    B = x_nchw.shape[0]

    # Same semantics as torch `x.view(B, -1)`. Stays f32: the kernel casts to
    # bf16 internally, so no extra HBM pass for a dtype conversion.
    x_flat = x_nchw.reshape(B, -1)

    # Batch tiling (double-buffered by the Pallas pipeline).
    tb = min(batch_tile, _round_up(B, 8))
    # Give a 2-TensorCore chip (v7x) at least two balanced "parallel" tiles when
    # the batch is big enough to be worth splitting.
    if B > 16 and pl.cdiv(B, tb) < 2:
        tb = _round_up(pl.cdiv(B, 2), 8)
    n_tiles = pl.cdiv(B, tb)
    b_pad = n_tiles * tb
    if b_pad != B:
        x_flat = jnp.pad(x_flat, ((0, b_pad - B), (0, 0)))

    out = pl.pallas_call(
        _mlp_kernel,
        out_shape=jax.ShapeDtypeStruct((b_pad, _OUT), jnp.float32),
        grid_spec=pltpu.PrefetchScalarGridSpec(
            num_scalar_prefetch=0,
            grid=(n_tiles,),
            in_specs=[
                pl.BlockSpec((tb, _IN), lambda i: (i, 0)),        # x: batch-tiled, f32
                pl.BlockSpec((_IN, _H), lambda i: (0, 0)),        # w1 (bf16, resident)
                pl.BlockSpec((1, _H), lambda i: (0, 0)),          # b1
                pl.BlockSpec((_H, _H), lambda i: (0, 0)),         # w2
                pl.BlockSpec((1, _H), lambda i: (0, 0)),          # b2
                pl.BlockSpec((_H, _OUT_PAD), lambda i: (0, 0)),   # w3 (padded, resident)
                pl.BlockSpec((1, _OUT_PAD), lambda i: (0, 0)),    # b3 (padded)
            ],
            out_specs=pl.BlockSpec((tb, _OUT), lambda i: (i, 0)),  # direct (tb, 10) store
        ),
        compiler_params=pltpu.CompilerParams(
            dimension_semantics=("parallel",),
            vmem_limit_bytes=32 * 1024 * 1024,
        ),
    )(x_flat, w1_bf, b1, w2, b2, w3_pad, b3_pad)

    if b_pad != B:
        out = out[:B]
    return out


def init_params(key):
    """Deterministic init, mimicking PyTorch Linear's U(-1/sqrt(fan_in), +1/sqrt(fan_in))."""
    def linear(key, fan_in, fan_out):
        kw, kb = jax.random.split(key)
        bound = 1.0 / jnp.sqrt(float(fan_in))
        # stored as (in, out) so the kernel computes x @ w + b
        w = jax.random.uniform(kw, (fan_in, fan_out), jnp.float32, -bound, bound)
        b = jax.random.uniform(kb, (1, fan_out), jnp.float32, -bound, bound)
        return w, b

    k1, k2, k3 = jax.random.split(key, 3)
    w1, b1 = linear(k1, _IN, _H)
    w2, b2 = linear(k2, _H, _H)
    w3, b3 = linear(k3, _H, _OUT)
    return (w1, b1, w2, b2, w3, b3)


def _reference(x_nchw, params):
    """Pure-JAX f32 reference (original PyTorch semantics)."""
    w1, b1, w2, b2, w3, b3 = params
    x = x_nchw.reshape(x_nchw.shape[0], -1)
    h1 = jax.nn.sigmoid(x @ w1 + b1)
    h2 = jax.nn.sigmoid(h1 @ w2 + b2)
    return jax.nn.softmax(h2 @ w3 + b3, axis=-1)


if __name__ == "__main__":
    key = jax.random.PRNGKey(0)
    k_params, k_x = jax.random.split(key)

    params = init_params(k_params)
    kparams = prepare_params(params)   # done once, outside the forward path

    # Small batch of MNIST-shaped inputs, NCHW like PyTorch.
    x = jax.random.normal(k_x, (8, 1, 28, 28), jnp.float32)

    out = neural_network_forward(x, kparams)
    out = jax.block_until_ready(out)

    ref = _reference(x, params)
    assert out.shape == (8, 10)
    # Tolerance relaxed vs. pure-f32 because x/w1 hit the MXU in bf16.
    assert jnp.allclose(out, ref, atol=5e-3, rtol=1e-2), "mismatch vs reference"
    assert jnp.allclose(jnp.sum(out, axis=-1), 1.0, atol=1e-3), "softmax rows must sum to 1"

    print("KERNEL_OK")
</pallas_src>

<mosaic_0001>
module attributes {stable_mosaic.version = 11 : i64} {
  func.func @_mlp_kernel(%arg0: i32, %arg1: memref<8x784xf32, #tpu.memory_space<vmem>>, %arg2: memref<784x32xbf16, #tpu.memory_space<vmem>>, %arg3: memref<1x32xf32, #tpu.memory_space<vmem>>, %arg4: memref<32x32xf32, #tpu.memory_space<vmem>>, %arg5: memref<1x32xf32, #tpu.memory_space<vmem>>, %arg6: memref<32x128xf32, #tpu.memory_space<vmem>>, %arg7: memref<1x128xf32, #tpu.memory_space<vmem>>, %arg8: memref<8x10xf32, #tpu.memory_space<vmem>>) attributes {dimension_semantics = [#tpu.dimension_semantics<parallel>], iteration_bounds = array<i64: 1>, scalar_prefetch = 0 : i64, scratch_operands = 0 : i64, tpu.core_type = #tpu.core_type<tc>, window_params = [{transform_indices = @transform_0, window_bounds = array<i64: 8, 784>}, {pipeline_mode = #tpu.pipeline_mode<synchronous>, transform_indices = @transform_1, window_bounds = array<i64: 784, 32>}, {pipeline_mode = #tpu.pipeline_mode<synchronous>, transform_indices = @transform_2, window_bounds = array<i64: 1, 32>}, {pipeline_mode = #tpu.pipeline_mode<synchronous>, transform_indices = @transform_3, window_bounds = array<i64: 32, 32>}, {pipeline_mode = #tpu.pipeline_mode<synchronous>, transform_indices = @transform_4, window_bounds = array<i64: 1, 32>}, {pipeline_mode = #tpu.pipeline_mode<synchronous>, transform_indices = @transform_5, window_bounds = array<i64: 32, 128>}, {pipeline_mode = #tpu.pipeline_mode<synchronous>, transform_indices = @transform_6, window_bounds = array<i64: 1, 128>}, {transform_indices = @transform_7, window_bounds = array<i64: 8, 10>}]} {
    %c0 = arith.constant 0 : index
    %c0_0 = arith.constant 0 : index
    %0 = vector.load %arg1[%c0, %c0_0] : memref<8x784xf32, #tpu.memory_space<vmem>>, vector<8x784xf32>
    %1 = arith.truncf %0 : vector<8x784xf32> to vector<8x784xbf16>
    %c0_1 = arith.constant 0 : index
    %c0_2 = arith.constant 0 : index
    %2 = vector.load %arg2[%c0_1, %c0_2] : memref<784x32xbf16, #tpu.memory_space<vmem>>, vector<784x32xbf16>
    %cst = arith.constant dense<0.000000e+00> : vector<8x32xf32>
    %3 = tpu.matmul %1, %2, %cst {dimension_numbers = #tpu.dot_dimension_numbers<[1], [0], [0], [1], [0, 0, 1, 1], [], []>} : vector<8x784xbf16>, vector<784x32xbf16>, vector<8x32xf32> -> vector<8x32xf32>
    %c0_3 = arith.constant 0 : index
    %c0_4 = arith.constant 0 : index
    %4 = vector.load %arg3[%c0_3, %c0_4] : memref<1x32xf32, #tpu.memory_space<vmem>>, vector<1x32xf32>
    %5 = vector.broadcast %4 : vector<1x32xf32> to vector<8x32xf32>
    %6 = arith.addf %3, %5 : vector<8x32xf32>
    %7 = arith.negf %6 : vector<8x32xf32>
    %8 = math.exp %7 : vector<8x32xf32>
    %cst_5 = arith.constant 1.000000e+00 : f32
    %9 = vector.broadcast %cst_5 : f32 to vector<8x32xf32>
    %10 = arith.addf %9, %8 : vector<8x32xf32>
    %11 = arith.divf %9, %10 : vector<8x32xf32>
    %c0_6 = arith.constant 0 : index
    %c0_7 = arith.constant 0 : index
    %12 = vector.load %arg4[%c0_6, %c0_7] : memref<32x32xf32, #tpu.memory_space<vmem>>, vector<32x32xf32>
    %cst_8 = arith.constant dense<0.000000e+00> : vector<8x32xf32>
    %13 = tpu.matmul %11, %12, %cst_8 {dimension_numbers = #tpu.dot_dimension_numbers<[1], [0], [0], [1], [0, 0, 1, 1], [], []>} : vector<8x32xf32>, vector<32x32xf32>, vector<8x32xf32> -> vector<8x32xf32>
    %c0_9 = arith.constant 0 : index
    %c0_10 = arith.constant 0 : index
    %14 = vector.load %arg5[%c0_9, %c0_10] : memref<1x32xf32, #tpu.memory_space<vmem>>, vector<1x32xf32>
    %15 = vector.broadcast %14 : vector<1x32xf32> to vector<8x32xf32>
    %16 = arith.addf %13, %15 : vector<8x32xf32>
    %17 = arith.negf %16 : vector<8x32xf32>
    %18 = math.exp %17 : vector<8x32xf32>
    %cst_11 = arith.constant 1.000000e+00 : f32
    %19 = vector.broadcast %cst_11 : f32 to vector<8x32xf32>
    %20 = arith.addf %19, %18 : vector<8x32xf32>
    %21 = arith.divf %19, %20 : vector<8x32xf32>
    %c0_12 = arith.constant 0 : index
    %c0_13 = arith.constant 0 : index
    %22 = vector.load %arg6[%c0_12, %c0_13] : memref<32x128xf32, #tpu.memory_space<vmem>>, vector<32x128xf32>
    %cst_14 = arith.constant dense<0.000000e+00> : vector<8x128xf32>
    %23 = tpu.matmul %21, %22, %cst_14 {dimension_numbers = #tpu.dot_dimension_numbers<[1], [0], [0], [1], [0, 0, 1, 1], [], []>} : vector<8x32xf32>, vector<32x128xf32>, vector<8x128xf32> -> vector<8x128xf32>
    %c0_15 = arith.constant 0 : index
    %c0_16 = arith.constant 0 : index
    %24 = vector.load %arg7[%c0_15, %c0_16] : memref<1x128xf32, #tpu.memory_space<vmem>>, vector<1x128xf32>
    %25 = vector.broadcast %24 : vector<1x128xf32> to vector<8x128xf32>
    %26 = arith.addf %23, %25 : vector<8x128xf32>
    %cst_17 = arith.constant dense<0xFF800000> : vector<8xf32>
    %27 = vector.multi_reduction <maximumf>, %26, %cst_17 [1] : vector<8x128xf32> to vector<8xf32>
    %28 = vector.shape_cast %27 : vector<8xf32> to vector<8x1xf32>
    %29 = vector.broadcast %28 : vector<8x1xf32> to vector<8x128xf32>
    %30 = arith.subf %26, %29 : vector<8x128xf32>
    %31 = math.exp %30 : vector<8x128xf32>
    %cst_18 = arith.constant dense<0.000000e+00> : vector<8xf32>
    %32 = vector.multi_reduction <add>, %31, %cst_18 [1] : vector<8x128xf32> to vector<8xf32>
    %33 = vector.shape_cast %32 : vector<8xf32> to vector<8x1xf32>
    %34 = tpu.reciprocal %33 : vector<8x1xf32> -> vector<8x1xf32>
    %35 = vector.broadcast %34 : vector<8x1xf32> to vector<8x128xf32>
    %36 = arith.mulf %31, %35 : vector<8x128xf32>
    %37 = vector.extract_strided_slice %36 {offsets = [0, 0], sizes = [8, 10], strides = [1, 1]} : vector<8x128xf32> to vector<8x10xf32>
    %c0_19 = arith.constant 0 : index
    %c0_20 = arith.constant 0 : index
    %38 = vector.load %arg8[%c0_19, %c0_20] : memref<8x10xf32, #tpu.memory_space<vmem>>, vector<8x10xf32>
    tpu.vector_store %arg8[%c0_19, %c0_20], %37 {strides = array<i32>} : memref<8x10xf32, #tpu.memory_space<vmem>>, vector<8x10xf32>,
    return
  }
  func.func @transform_0(%arg0: i32) -> (i32, i32) {
    %c0_i32 = arith.constant 0 : i32
    %c0_i32_0 = arith.constant 0 : i32
    return %arg0, %c0_i32 : i32, i32
  }
  func.func @transform_1(%arg0: i32) -> (i32, i32) {
    %c0_i32 = arith.constant 0 : i32
    %c0_i32_0 = arith.constant 0 : i32
    %c0_i32_1 = arith.constant 0 : i32
    return %c0_i32, %c0_i32_0 : i32, i32
  }
  func.func @transform_2(%arg0: i32) -> (i32, i32) {
    %c0_i32 = arith.constant 0 : i32
    %c0_i32_0 = arith.constant 0 : i32
    %c0_i32_1 = arith.constant 0 : i32
    return %c0_i32, %c0_i32_0 : i32, i32
  }
  func.func @transform_3(%arg0: i32) -> (i32, i32) {
    %c0_i32 = arith.constant 0 : i32
    %c0_i32_0 = arith.constant 0 : i32
    %c0_i32_1 = arith.constant 0 : i32
    return %c0_i32, %c0_i32_0 : i32, i32
  }
  func.func @transform_4(%arg0: i32) -> (i32, i32) {
    %c0_i32 = arith.constant 0 : i32
    %c0_i32_0 = arith.constant 0 : i32
    %c0_i32_1 = arith.constant 0 : i32
    return %c0_i32, %c0_i32_0 : i32, i32
  }
  func.func @transform_5(%arg0: i32) -> (i32, i32) {
    %c0_i32 = arith.constant 0 : i32
    %c0_i32_0 = arith.constant 0 : i32
    %c0_i32_1 = arith.constant 0 : i32
    return %c0_i32, %c0_i32_0 : i32, i32
  }
  func.func @transform_6(%arg0: i32) -> (i32, i32) {
    %c0_i32 = arith.constant 0 : i32
    %c0_i32_0 = arith.constant 0 : i32
    %c0_i32_1 = arith.constant 0 : i32
    return %c0_i32, %c0_i32_0 : i32, i32
  }
  func.func @transform_7(%arg0: i32) -> (i32, i32) {
    %c0_i32 = arith.constant 0 : i32
    %c0_i32_0 = arith.constant 0 : i32
    return %arg0, %c0_i32 : i32, i32
  }
}

</mosaic_0001>

<bundles_post_ra>
// kernel: tpu_custom_call.1
= control target key start
LH: loop header
LB: loop body
LE: loop exit
PB: predicated region body
PF: predicated region fallthrough
CT: control target
= control target key end

     0   :  { %s1213_s0 = inlined_call_operand.vmem [shape: f32[8,784], index: 0, kind: input, shape index: {}]   ;;  %s1214_s1 = inlined_call_operand.vmem [shape: bf16[784,32], index: 1, kind: input, shape index: {}]   ;;  %s1215_s2 = inlined_call_operand.vmem [shape: f32[1,32], index: 2, kind: input, shape index: {}]   ;;  %s1216_s3 = inlined_call_operand.vmem [shape: f32[32,32], index: 3, kind: input, shape index: {}]   ;;  %s1217_s4 = inlined_call_operand.vmem [shape: f32[1,32], index: 4, kind: input, shape index: {}]   ;;  %s1218_s5 = inlined_call_operand.vmem [shape: f32[32,128], index: 5, kind: input, shape index: {}]   ;;  %s1219_s6 = inlined_call_operand.vmem [shape: f32[1,128], index: 6, kind: input, shape index: {}]   ;;  %s1220_s7 = inlined_call_operand.hbm [shape: f32[8,10], index: 7, kind: output, shape index: {}]  }
   0x1   :  { %v882_v0 = vld [vmem:[%s1214_s1 + $0x38] sm:$0xff]  ;;  %v881_v3 = vld [vmem:[%s1214_s1 + $0x30] sm:$0xff]  ;;  %v880_v8 = vld [vmem:[%s1214_s1 + $0x28] sm:$0xff] }
   0x2   :  { %v890_v1 = vld [vmem:[%s1214_s1 + $0x78] sm:$0xff]  ;;  %442 = vmatpush.bf16.msra.mxu0 %v882_v0  ;;  %v889_v4 = vld [vmem:[%s1214_s1 + $0x70] sm:$0xff]  ;;  %v888_v9 = vld [vmem:[%s1214_s1 + $0x68] sm:$0xff] }
   0x3   :  { %v898_v2 = vld [vmem:[%s1214_s1 + $0xb8] sm:$0xff]  ;;  %455 = vmatpush.bf16.msra.mxu1 %v890_v1  ;;  %v897_v5 = vld [vmem:[%s1214_s1 + $0xb0] sm:$0xff]  ;;  %v896_v10 = vld [vmem:[%s1214_s1 + $0xa8] sm:$0xff] }
   0x4   :  { %468 = vmatpush.bf16.msra.mxu2 %v898_v2  ;;  %v906_v6 = vld [vmem:[%s1214_s1 + $0xf8] sm:$0xff]  ;;  %v905_v7 = vld [vmem:[%s1214_s1 + $0xf0] sm:$0xff]  ;;  %v904_v11 = vld [vmem:[%s1214_s1 + $0xe8] sm:$0xff] }
   0x5   :  { %481 = vmatpush.bf16.msra.mxu3 %v906_v6  ;;  %v879_v12 = vld [vmem:[%s1214_s1 + $0x20] sm:$0xff]  ;;  %v878_v16 = vld [vmem:[%s1214_s1 + $0x18] sm:$0xff] }
   0x6   :  { %443 = vmatpush.bf16.msra.mxu0 %v881_v3  ;;  %v887_v13 = vld [vmem:[%s1214_s1 + $0x60] sm:$0xff]  ;;  %v886_v17 = vld [vmem:[%s1214_s1 + $0x58] sm:$0xff] }
   0x7   :  { %456 = vmatpush.bf16.msra.mxu1 %v889_v4  ;;  %v895_v14 = vld [vmem:[%s1214_s1 + $0xa0] sm:$0xff]  ;;  %v894_v18 = vld [vmem:[%s1214_s1 + $0x98] sm:$0xff] }
   0x8   :  { %469 = vmatpush.bf16.msra.mxu2 %v897_v5  ;;  %v903_v15 = vld [vmem:[%s1214_s1 + $0xe0] sm:$0xff]  ;;  %v902_v19 = vld [vmem:[%s1214_s1 + $0xd8] sm:$0xff] }
   0x9   :  { %482 = vmatpush.bf16.msra.mxu3 %v905_v7 }
   0xa   :  { %444 = vmatpush.bf16.msra.mxu0 %v880_v8 }
   0xb   :  { %457 = vmatpush.bf16.msra.mxu1 %v888_v9 }
   0xc   :  { %470 = vmatpush.bf16.msra.mxu2 %v896_v10 }
   0xd   :  { %483 = vmatpush.bf16.msra.mxu3 %v904_v11 }
   0xe   :  { %445 = vmatpush.bf16.msra.mxu0 %v879_v12 }
   0xf   :  { %458 = vmatpush.bf16.msra.mxu1 %v887_v13 }
  0x10   :  { %471 = vmatpush.bf16.msra.mxu2 %v895_v14 }
  0x11   :  { %484 = vmatpush.bf16.msra.mxu3 %v903_v15 }
  0x12   :  { %12 = vsyncpa [#allocation3], 0  ;;  %446 = vmatpush.bf16.msra.mxu0 %v878_v16  ;;  %v877_v20 = vld [vmem:[%s1214_s1 + $0x10] sm:$0xff]  ;;  %v876_v24 = vld [vmem:[%s1214_s1 + $0x8] sm:$0xff]  ;;  %vm438_vm0 = vcmask 130048   ;;  %vm560_vm4 = vcmask 261120  }
  0x13   :  { %459 = vmatpush.bf16.msra.mxu1 %v886_v17  ;;  %v885_v21 = vld [vmem:[%s1214_s1 + $0x50] sm:$0xff]  ;;  %v884_v25 = vld [vmem:[%s1214_s1 + $0x48] sm:$0xff]  ;;  %v875_v27 = vld [vmem:[%s1214_s1] sm:$0xff]  ;;  %s665_s17 = sshll.u32 %s1220_s7, 4  ;;  %vm656_vm14 = vcmask 80896   ;;  %s666_s17 = int_to_ptr.hbm [resolvable:$true] %s665_s17 }
  0x14   :  { %472 = vmatpush.bf16.msra.mxu2 %v894_v18  ;;  %v893_v22 = vld [vmem:[%s1214_s1 + $0x90] sm:$0xff]  ;;  %v892_v26 = vld [vmem:[%s1214_s1 + $0x88] sm:$0xff]  ;;  %v883_v29 = vld [vmem:[%s1214_s1 + $0x40] sm:$0xff] }
  0x15   :  { %485 = vmatpush.bf16.msra.mxu3 %v902_v19  ;;  %v901_v23 = vld [vmem:[%s1214_s1 + $0xd0] sm:$0xff]  ;;  %v900_v28 = vld [vmem:[%s1214_s1 + $0xc8] sm:$0xff]  ;;  %v28_v30 = vld [vmem:[%s1213_s0] sm:$0xff] }
  0x16   :  { %447 = vmatpush.bf16.msra.mxu0 %v877_v20  ;;  %v29_v31 = vld [vmem:[%s1213_s0 + $0x8] sm:$0xff]  ;;  %v914_v32 = vld [vmem:[%s1214_s1 + $0x138] sm:$0xff]  ;;  %v891_v34 = vld [vmem:[%s1214_s1 + $0x80] sm:$0xff]  ;;  %v35_v36 = vpack.c.bf16 %v28_v30, %v28_v30 }
  0x17   :  { %460 = vmatpush.bf16.msra.mxu1 %v885_v21  ;;  %v922_v33 = vld [vmem:[%s1214_s1 + $0x178] sm:$0xff]  ;;  %v30_v35 = vld [vmem:[%s1213_s0 + $0x10] sm:$0xff]  ;;  %v36_v37 = vpack.c.bf16 %v29_v31, %v29_v31  ;;  %v899_v38 = vld [vmem:[%s1214_s1 + $0xc0] sm:$0xff] }
  0x18   :  { %473 = vmatpush.bf16.msra.mxu2 %v893_v22  ;;  %v923_v39 = vld [vmem:[%s1214_s1 + $0x180] sm:$0xff]  ;;  %v31_v40 = vld [vmem:[%s1213_s0 + $0x18] sm:$0xff]  ;;  %v913_v41 = vld [vmem:[%s1214_s1 + $0x130] sm:$0xff]  ;;  %v37_v43 = vpack.c.bf16 %v30_v35, %v30_v35 }
  0x19   :  { %486 = vmatpush.bf16.msra.mxu3 %v901_v23  ;;  %v921_v42 = vld [vmem:[%s1214_s1 + $0x170] sm:$0xff]  ;;  %v38_v44 = vpack.c.bf16 %v31_v40, %v31_v40  ;;  %v912_v45 = vld [vmem:[%s1214_s1 + $0x128] sm:$0xff]  ;;  %v911_v47 = vld [vmem:[%s1214_s1 + $0x120] sm:$0xff] }
  0x1a   :  { %448 = vmatpush.bf16.msra.mxu0 %v876_v24  ;;  %v920_v46 = vld [vmem:[%s1214_s1 + $0x168] sm:$0xff]  ;;  %v919_v48 = vld [vmem:[%s1214_s1 + $0x160] sm:$0xff]  ;;  %v910_v49 = vld [vmem:[%s1214_s1 + $0x118] sm:$0xff] }
  0x1b   :  { %461 = vmatpush.bf16.msra.mxu1 %v884_v25  ;;  %v918_v50 = vld [vmem:[%s1214_s1 + $0x158] sm:$0xff]  ;;  %v34_v51 = vld [vmem:[%s1213_s0 + $0x30] sm:$0xff]  ;;  %v908_v55 = vld [vmem:[%s1214_s1 + $0x108] sm:$0xff] }
  0x1c   :  { %474 = vmatpush.bf16.msra.mxu2 %v892_v26  ;;  %v909_v52 = vld [vmem:[%s1214_s1 + $0x110] sm:$0xff]  ;;  %v41_v54 = vpack.c.bf16 %v34_v51, %v34_v51  ;;  %v916_v56 = vld [vmem:[%s1214_s1 + $0x148] sm:$0xff]  ;;  %v907_v57 = vld [vmem:[%s1214_s1 + $0x100] sm:$0xff] }
  0x1d   :  { %487 = vmatpush.bf16.msra.mxu3 %v900_v28  ;;  %v917_v53 = vld [vmem:[%s1214_s1 + $0x150] sm:$0xff]  ;;  %v915_v58 = vld [vmem:[%s1214_s1 + $0x140] sm:$0xff]  ;;  %v33_v60 = vld [vmem:[%s1213_s0 + $0x28] sm:$0xff] }
  0x1e   :  { %449 = vmatpush.bf16.msra.mxu0 %v875_v27  ;;  %v32_v59 = vld [vmem:[%s1213_s0 + $0x20] sm:$0xff]  ;;  %v40_v62 = vpack.c.bf16 %v33_v60, %v33_v60  ;;  %v555_v6 = vld [vmem:[%s1216_s3 + $0x18] sm:$0xff]  ;;  %v554_v7 = vld [vmem:[%s1216_s3 + $0x10] sm:$0xff] }
  0x1f   :  { %462 = vmatpush.bf16.msra.mxu1 %v883_v29  ;;  %v39_v61 = vpack.c.bf16 %v32_v59, %v32_v59  ;;  %v925_v5 = vld [vmem:[%s1215_s2] ss:$0 sm:$0xff]  ;;  %v553_v10 = vld [vmem:[%s1216_s3 + $0x8] sm:$0xff] }
  0x20   :  { %475 = vmatpush.bf16.msra.mxu2 %v891_v34  ;;  %v552_v12 = vld [vmem:[%s1216_s3] sm:$0xff]  ;;  %v604_v40 = vld [vmem:[%s1218_s5 + $0x8] sm:$0xff] }
  0x21   :  { %450 = vmatmul.bf16.vlgmr.msra.gmra.mxu0 %v35_v36  ;;  %488 = vmatpush.bf16.msra.mxu3 %v899_v38  ;;  %v606_v38 = vld [vmem:[%s1218_s5 + $0x18] sm:$0xff] }
  0x22   :  { %494 = vmatpush.bf16.msrb.mxu0 %v914_v32  ;;  %463 = vmatmul.bf16.vlgmr.msra.gmra.mxu1 %v36_v37 }
  0x23   :  { %507 = vmatpush.bf16.msrb.mxu1 %v922_v33  ;;  %476 = vmatmul.bf16.vlgmr.msra.gmra.mxu2 %v37_v43 }
  0x24   :  { %527 = vmatpush.bf16.msrb.mxu2 %v923_v39  ;;  %489 = vmatmul.bf16.vlgmr.msra.gmra.mxu3 %v38_v44  ;;  %v605_v39 = vld [vmem:[%s1218_s5 + $0x10] sm:$0xff] }
  0x25   :  { %576 = vmatpush.msrb.mxu3 %v555_v6 }
  0x26   :  { %495 = vmatpush.bf16.msrb.mxu0 %v913_v41  ;;  %v603_v41 = vld [vmem:[%s1218_s5] sm:$0xff] }
  0x27   :  { %508 = vmatpush.bf16.msrb.mxu1 %v921_v42  ;;  %577 = vmatpush.msrb.mxu3 %v554_v7  ;;  %v926_v42 = vld [vmem:[%s1217_s4] ss:$0 sm:$0xff] }
  0x29   :  { %578 = vmatpush.msrb.mxu3 %v553_v10 }
  0x2a   :  { %496 = vmatpush.bf16.msrb.mxu0 %v912_v45 }
  0x2b   :  { %509 = vmatpush.bf16.msrb.mxu1 %v920_v46  ;;  %579 = vmatpush.msrb.mxu3 %v552_v12 }
  0x2d   :  { %626 = vmatpush.msra.mxu3 %v606_v38 }
  0x2e   :  { %497 = vmatpush.bf16.msrb.mxu0 %v911_v47 }
  0x2f   :  { %510 = vmatpush.bf16.msrb.mxu1 %v919_v48  ;;  %627 = vmatpush.msra.mxu3 %v605_v39 }
  0x31   :  { %628 = vmatpush.msra.mxu3 %v604_v40 }
  0x32   :  { %498 = vmatpush.bf16.msrb.mxu0 %v910_v49 }
  0x33   :  { %511 = vmatpush.bf16.msrb.mxu1 %v918_v50  ;;  %870 = vmatmul.msk.bf16.vlgmr.msrb.gmra.mxu2 %vm438_vm0, %v41_v54 }
  0x34   :  { %629 = vmatpush.msra.mxu3 %v603_v41 }
  0x36   :  { %499 = vmatpush.bf16.msrb.mxu0 %v909_v52 }
  0x37   :  { %512 = vmatpush.bf16.msrb.mxu1 %v917_v53 }
  0x3a   :  { %500 = vmatpush.bf16.msrb.mxu0 %v908_v55 }
  0x3b   :  { %513 = vmatpush.bf16.msrb.mxu1 %v916_v56 }
  0x3e   :  { %501 = vmatpush.bf16.msrb.mxu0 %v907_v57 }
  0x3f   :  { %514 = vmatpush.bf16.msrb.mxu1 %v915_v58  ;;  %v927_v58 = vld [vmem:[%s1219_s6] ss:$0 sm:$0xff]  ;;  %s966_s6 = smov [#allocation2]  }
  0x40   :  { %s663_s14 = sshll.u32 %s966_s6, 4  ;;  %s664_s14 = int_to_ptr.vmem [resolvable:$true] %s663_s14 }
  0x41   :  { %502 = vmatmul.bf16.vlgmr.msrb.gmra.mxu0 %v39_v61 }
  0x42   :  { %515 = vmatmul.bf16.vlgmr.msrb.gmra.mxu1 %v40_v62 }
  0x9e   :  { %v451_v63 = vpop.f32.mrf.mxu0 }
  0x9f   :  { %v464_v0 = vpop.f32.mrf.mxu1  ;;  %v452_v8 = vadd.f32 %v925_v5, %v451_v63 }
  0xa1   :  { %v465_v13 = vadd.f32 %v464_v0, %v452_v8 }
  0xa6   :  { %v453_v1 = vpop.f32.mrf.mxu0  ;;  %v477_v3 = vpop.f32.mrf.mxu2 }
  0xa7   :  { %v466_v2 = vpop.f32.mrf.mxu1  ;;  %v490_v4 = vpop.f32.mrf.mxu3  ;;  %v478_v14 = vadd.f32 %v477_v3, %v465_v13 }
  0xa9   :  { %v491_v16 = vadd.f32 %v490_v4, %v478_v14 }
  0xae   :  { %v479_v9 = vpop.f32.mrf.mxu2 }
  0xaf   :  { %v492_v11 = vpop.f32.mrf.mxu3 }
  0xb6   :  { %v529_v15 = vpop.f32.mrf.mxu2 }
  0xbe   :  { %v503_v17 = vpop.f32.mrf.mxu0  ;;  %v531_v21 = vpop.f32.mrf.mxu2 }
  0xbf   :  { %v516_v18 = vpop.f32.mrf.mxu1  ;;  %v504_v19 = vadd.f32 %v503_v17, %v491_v16 }
  0xc1   :  { %v517_v20 = vadd.f32 %v516_v18, %v504_v19 }
  0xc3   :  { %v530_v22 = vadd.f32 %v529_v15, %v517_v20 }
  0xc5   :  { %v871_v23 = vmul.f32 -1.442695, %v530_v22 }
  0xc6   :  { %v505_v24 = vpop.f32.mrf.mxu0 }
  0xc7   :  { %v518_v25 = vpop.f32.mrf.mxu1  ;;  %928 = vpow2.f32 %v871_v23 }
  0xcd   :  { %v929_v26 = vpop.eup %928 }
  0xce   :  { %v536_v27 = vadd.f32 1.0, %v929_v26 }
  0xd0   :  { %930 = vrcp.f32 %v536_v27  ;;  %v548_v31 = vand.u32 2147483648, %v536_v27  ;;  %v546_v33 = vand.u32 2147483647, %v536_v27  ;;  %vm542_vm2 = vweird.f32 %v536_v27 }
  0xd2   :  { %v549_v35 = vor.u32 1.1754944e-38, %v548_v31  ;;  %vm547_vm5 = vcmp.eq.f32.partialorder %v546_v33, 8.507059e+37 }
  0xd6   :  { %v931_v28 = vpop.eup %930 }
  0xd7   :  { %v538_v29 = vmul.f32 %v931_v28, %v536_v27  ;;  %vm543_vm1 = vweird.f32 %v931_v28 }
  0xd8   :  { %vm544_vm3 = vmor %vm542_vm2, %vm543_vm1 }
  0xd9   :  { %v539_v30 = vsub.f32 1.0, %v538_v29 }
  0xdb   :  { %v540_v32 = vmul.f32 %v931_v28, %v539_v30 }
  0xdd   :  { %v541_v34 = vadd.f32 %v931_v28, %v540_v32 }
  0xdf   :  { %v545_v36 = vsel %vm544_vm3, %v931_v28, %v541_v34 }
  0xe0   :  { %v550_v37 = vsel %vm547_vm5, %v549_v35, %v545_v36 }
  0xe1   :  { %872 = vmatmul.msk.f32.vlgmr.msrb.gmra.mxu3 %vm560_vm4, %v550_v37 }
 0x164   :  { %v581_v43 = vpop.f32.mrf.mxu3 }
 0x165   :  { %v582_v44 = vadd.f32 %v926_v42, %v581_v43 }
 0x167   :  { %v873_v45 = vmul.f32 -1.442695, %v582_v44 }
 0x169   :  { %932 = vpow2.f32 %v873_v45 }
 0x16f   :  { %v933_v46 = vpop.eup %932 }
 0x170   :  { %v587_v47 = vadd.f32 1.0, %v933_v46 }
 0x172   :  { %934 = vrcp.f32 %v587_v47  ;;  %v599_v51 = vand.u32 2147483648, %v587_v47  ;;  %v597_v53 = vand.u32 2147483647, %v587_v47  ;;  %vm593_vm7 = vweird.f32 %v587_v47 }
 0x174   :  { %v600_v55 = vor.u32 1.1754944e-38, %v599_v51  ;;  %vm598_vm9 = vcmp.eq.f32.partialorder %v597_v53, 8.507059e+37 }
 0x178   :  { %v935_v48 = vpop.eup %934 }
 0x179   :  { %v589_v49 = vmul.f32 %v935_v48, %v587_v47  ;;  %vm594_vm6 = vweird.f32 %v935_v48 }
 0x17a   :  { %vm595_vm8 = vmor %vm593_vm7, %vm594_vm6 }
 0x17b   :  { %v590_v50 = vsub.f32 1.0, %v589_v49 }
 0x17d   :  { %v591_v52 = vmul.f32 %v935_v48, %v590_v50 }
 0x17f   :  { %v592_v54 = vadd.f32 %v935_v48, %v591_v52 }
 0x181   :  { %v596_v56 = vsel %vm595_vm8, %v935_v48, %v592_v54 }
 0x182   :  { %v601_v57 = vsel %vm598_vm9, %v600_v55, %v596_v56 }
 0x183   :  { %874 = vmatmul.msk.f32.vlgmr.msra.gmra.mxu3 %vm560_vm4, %v601_v57 }
 0x206   :  { %v631_v59 = vpop.f32.mrf.mxu3 }
 0x207   :  { %v632_v60 = vadd.f32 %v927_v58, %v631_v59 }
 0x209   :  { %634 = vmax.xlane.f32.xlu0 %v632_v60 }
 0x27c   :  { %v635_v61 = vpop.xlane.xlu0 %634 }
 0x27d   :  { %v636_v62 = vsub.f32 %v632_v60, %v635_v61 }
 0x27f   :  { %v637_v63 = vmul.f32 1.442695, %v636_v62 }
 0x281   :  { %936 = vpow2.f32 %v637_v63 }
 0x287   :  { %v937_v0 = vpop.eup %936 }
 0x288   :  { %639 = vadd.xlane.f32.xlu0 %v937_v0 }
 0x2fb   :  { %v640_v1 = vpop.xlane.xlu0 %639 }
 0x2fc   :  { %938 = vrcp.f32 %v640_v1  ;;  %v652_v5 = vand.u32 2147483648, %v640_v1  ;;  %v650_v7 = vand.u32 2147483647, %v640_v1  ;;  %vm646_vm11 = vweird.f32 %v640_v1 }
 0x2fe   :  { %v653_v9 = vor.u32 1.1754944e-38, %v652_v5  ;;  %vm651_vm13 = vcmp.eq.f32.partialorder %v650_v7, 8.507059e+37 }
 0x302   :  { %v939_v2 = vpop.eup %938 }
 0x303   :  { %v642_v3 = vmul.f32 %v939_v2, %v640_v1  ;;  %vm647_vm10 = vweird.f32 %v939_v2 }
 0x304   :  { %vm648_vm12 = vmor %vm646_vm11, %vm647_vm10 }
 0x305   :  { %v643_v4 = vsub.f32 1.0, %v642_v3 }
 0x307   :  { %v644_v6 = vmul.f32 %v939_v2, %v643_v4 }
 0x309   :  { %v645_v8 = vadd.f32 %v939_v2, %v644_v6 }
 0x30b   :  { %v649_v10 = vsel %vm648_vm12, %v939_v2, %v645_v8 }
 0x30c   :  { %v654_v11 = vsel %vm651_vm13, %v653_v9, %v649_v10 }
 0x30d   :  { %v655_v12 = vmul.f32 %v937_v0, %v654_v11 }
 0x30f   :  { %657 = vst.msk [vmem:[#allocation2] sm:$0xff] %vm656_vm14, %v655_v12 }
 0x310   :  { %668 = dma.vmem_to_hbm [thread:$0]  %s664_s14, 128, %s666_s17, [#allocation3]  }
 0x311   :  { %964 = dma.done.wait [#allocation3], 128  }
 0x312   :  { %965 = vsyncadd [#allocation3], 4294967168 }
 0x313   :  { %673 = vsyncpa [#allocation3], 1 }

</bundles_post_ra>
